<compile_context>
chip_gen: v5e
topology: v5e:2x2
jax: 0.10.0
libtpu: 0.0.40
codegen_flags: <defaults>
</compile_context>

<pallas_src>
import jax
import jax.numpy as jnp
from jax import lax
from jax.experimental import pallas as pl
from jax.experimental.pallas import tpu as pltpu

_LANE = 128


def _round_up(x, m):
    return (x + m - 1) // m * m


# --------------------------------------------------------------------------
# Kernels
# --------------------------------------------------------------------------
def _qkv_proj_kernel(x_ref, w_ref, b_ref, qkv_ref):
    """qkv = x @ [Wq | Wk | Wv] + [bq | bk | bv] for one (batch, seq-tile)."""
    y = jnp.dot(x_ref[0], w_ref[...], preferred_element_type=jnp.float32)
    qkv_ref[0] = (y + b_ref[...]).astype(qkv_ref.dtype)


def _flash_attn_kernel(q_ref, k_ref, v_ref, wout_ref, bout_ref, o_ref,
                       m_s, l_s, acc_s):
    """Grid = (batch, q_tile, kv_tile); kv_tile is the innermost (reduction)
    axis.  Online-softmax scratch (m_s, l_s, acc_s) persists across kv steps.
    The output projection (to_out) is fused into the finalize step."""
    ki = pl.program_id(2)
    nk = pl.num_programs(2)

    @pl.when(ki == 0)
    def _init():
        m_s[...] = jnp.full_like(m_s, -jnp.inf)
        l_s[...] = jnp.zeros_like(l_s)
        acc_s[...] = jnp.zeros_like(acc_s)

    q = q_ref[0]                                       # (TQ, Fp) bf16
    k = k_ref[0]                                       # (TK, Fp) bf16

    # scores = q @ k^T without an explicit transpose (contract feature dim).
    # NOTE: intentionally NO 1/sqrt(d) scaling -- the PyTorch module has none.
    s = lax.dot_general(q, k,
                        dimension_numbers=(((1,), (1,)), ((), ())),
                        preferred_element_type=jnp.float32)   # (TQ, TK) f32

    # ---- online softmax update (statistics m/l/acc stay in f32) -----------
    m_prev = m_s[...]
    m_new = jnp.maximum(m_prev, jnp.max(s, axis=-1, keepdims=True))
    alpha = jnp.exp(m_prev - m_new)                    # (TQ, 1) f32
    # exp in bf16: 2x EUP rate on v6e/v7x, half the vreg/VMEM footprint, and
    # p feeds the p@V MXU matmul directly (no separate cast).
    p = jnp.exp((s - m_new).astype(jnp.bfloat16))      # (TQ, TK) bf16
    l_s[...] = alpha * l_s[...] + jnp.sum(p, axis=-1, keepdims=True,
                                          dtype=jnp.float32)
    acc_s[...] = alpha * acc_s[...] + jnp.dot(
        p, v_ref[0], preferred_element_type=jnp.float32)
    m_s[...] = m_new

    @pl.when(ki == nk - 1)
    def _finalize():
        # Exact divide: runs once per q tile on a (TQ, Fp) block, so the cost
        # is negligible and softmax-normalization accuracy is preserved.
        out = acc_s[...] / l_s[...]                    # (TQ, Fp) f32
        y = jnp.dot(out.astype(wout_ref.dtype), wout_ref[...],
                    preferred_element_type=jnp.float32)
        o_ref[0] = (y + bout_ref[...]).astype(o_ref.dtype)


# --------------------------------------------------------------------------
# Host-side parameter preparation (do ONCE, not per forward call)
# --------------------------------------------------------------------------
def prepare_attention_params(w_qkv, b_qkv, w_out, b_out, *, out_dim,
                             compute_dtype=jnp.bfloat16):
    """PyTorch Linear layouts in:
         w_qkv: (3*out_dim, D), b_qkv: (3*out_dim,)
         w_out: (D, out_dim),   b_out: (D,)
       Returns fused / pre-transposed / zero-padded / pre-cast params.

       out_dim (F) is zero-padded up to a multiple of 128 lanes.  Padding is
       numerically exact: zero Q/K columns add 0 to the scores and zero V
       columns produce zero acc columns that only meet zero W_out rows."""
    D = w_qkv.shape[1]
    F = out_dim
    Fp = _round_up(F, _LANE)

    def _pad_cols(w):                      # (D, F) -> (D, Fp)
        return jnp.pad(w, ((0, 0), (0, Fp - F)))

    wq = _pad_cols(jnp.transpose(w_qkv[0 * F:1 * F]))
    wk = _pad_cols(jnp.transpose(w_qkv[1 * F:2 * F]))
    wv = _pad_cols(jnp.transpose(w_qkv[2 * F:3 * F]))
    # One fused (D, 3*Fp) projection matrix -> a single MXU matmul per tile.
    w_qkv_f = jnp.concatenate([wq, wk, wv], axis=1).astype(compute_dtype)

    def _pad_bias(b):                      # (F,) -> (1, Fp)
        return jnp.pad(b, (0, Fp - F)).reshape(1, Fp)

    b_qkv_f = jnp.concatenate(
        [_pad_bias(b_qkv[0 * F:1 * F]),
         _pad_bias(b_qkv[1 * F:2 * F]),
         _pad_bias(b_qkv[2 * F:3 * F])], axis=1).astype(jnp.float32)

    wout = jnp.pad(jnp.transpose(w_out), ((0, Fp - F), (0, 0)))   # (Fp, D)
    wout = wout.astype(compute_dtype)
    bout = b_out.reshape(1, D).astype(jnp.float32)

    return dict(w_qkv=w_qkv_f, b_qkv=b_qkv_f, wout=wout, bout=bout,
                dim=D, out_dim=F, out_dim_padded=Fp,
                compute_dtype=compute_dtype)


# --------------------------------------------------------------------------
# Tiling helpers
# --------------------------------------------------------------------------
def _pick_tile(n, target):
    """Largest divisor of n that is <= target, preferring MXU-friendly
    multiples (256, then 128), then bf16 sublane-packing multiples of 16."""
    if n <= target:
        return n
    for m in (256, 128, 16):
        t = target - target % m
        while t >= m:
            if n % t == 0:
                return t
            t -= m
    # TODO(synk): ragged / awkward N falls back to a full-sequence tile (no
    # masking path); this can blow VMEM for very large prime-ish N.
    return n


def _default_tiles():
    """Chip-aware default (TQ, TK): smaller tiles on v5e (128-wide MXU,
    single vector-store slot, ~0.8 TB/s HBM)."""
    try:
        kind = jax.devices()[0].device_kind.lower()
    except Exception:
        kind = ""
    if "v5 lite" in kind or "v5e" in kind or "v5litepod" in kind:
        return 128, 256
    return 256, 512


def _resident_spec(block_shape, index_map, single_buffer):
    """BlockSpec for an operand whose block index never changes over the
    grid: single-buffer it (pl.Buffered(1)) so it is not pointlessly
    double-buffered in VMEM (matters most on v7x's 64 MiB VMEM)."""
    if single_buffer:
        return pl.BlockSpec(block_shape, index_map,
                            pipeline_mode=pl.Buffered(1))
    return pl.BlockSpec(block_shape, index_map)


# --------------------------------------------------------------------------
# Forward
# --------------------------------------------------------------------------
def _attention_impl(x, params, tq, tk, single_buffer_weights):
    B, N, D = x.shape
    Fp = params["out_dim_padded"]
    cdt = params["compute_dtype"]

    dtq, dtk = _default_tiles()
    tq = dtq if tq is None else tq
    tk = dtk if tk is None else tk

    TQ = _pick_tile(N, tq)
    TK = _pick_tile(N, tk)
    # Keep both v7x TensorCores busy: need >= 2 independent (b, qi) steps.
    if B * (N // TQ) < 2 and TQ % 32 == 0:
        TQ //= 2
    TM = TQ                               # sequence tile for the projection
    nq, nk, nm = N // TQ, N // TK, N // TM

    x_c = x.astype(cdt)                   # cast once; MXU operands are bf16

    # 32 MiB scoped VMEM: ~8x what these tiles need, and only half of v7x's
    # 64 MiB physical VMEM (the previous 48 MiB left too little headroom).
    vmem_limit = 32 * 1024 * 1024

    # ---- kernel 1: fused QKV projection (hoisted out of the kv loop) ------
    qkv = pl.pallas_call(
        _qkv_proj_kernel,
        out_shape=jax.ShapeDtypeStruct((B, N, 3 * Fp), cdt),
        grid_spec=pltpu.PrefetchScalarGridSpec(
            num_scalar_prefetch=0,
            grid=(B, nm),
            in_specs=[
                pl.BlockSpec((1, TM, D), lambda b, i: (b, i, 0)),
                _resident_spec((D, 3 * Fp), lambda b, i: (0, 0),
                               single_buffer_weights),
                _resident_spec((1, 3 * Fp), lambda b, i: (0, 0),
                               single_buffer_weights),
            ],
            out_specs=pl.BlockSpec((1, TM, 3 * Fp), lambda b, i: (b, i, 0)),
        ),
        compiler_params=pltpu.CompilerParams(
            dimension_semantics=("parallel", "parallel"),
            vmem_limit_bytes=vmem_limit,
        ),
    )(x_c, params["w_qkv"], params["b_qkv"])

    # ---- kernel 2: flash attention + fused output projection --------------
    grid_spec = pltpu.PrefetchScalarGridSpec(
        num_scalar_prefetch=0,
        grid=(B, nq, nk),
        in_specs=[
            # q / k / v are lane-aligned (Fp % 128 == 0) windows into the
            # same precomputed qkv tensor (passed three times below).
            # q is double-buffered (it changes along the qi axis) so its DMA
            # hides behind the last kv step of the previous q tile.
            pl.BlockSpec((1, TQ, Fp), lambda b, qi, ki: (b, qi, 0)),
            pl.BlockSpec((1, TK, Fp), lambda b, qi, ki: (b, ki, 1)),
            pl.BlockSpec((1, TK, Fp), lambda b, qi, ki: (b, ki, 2)),
            _resident_spec((Fp, D), lambda b, qi, ki: (0, 0),
                           single_buffer_weights),
            _resident_spec((1, D), lambda b, qi, ki: (0, 0),
                           single_buffer_weights),
        ],
        out_specs=pl.BlockSpec((1, TQ, D), lambda b, qi, ki: (b, qi, 0)),
        scratch_shapes=[
            pltpu.VMEM((TQ, 1), jnp.float32),    # running max m
            pltpu.VMEM((TQ, 1), jnp.float32),    # running sum l
            pltpu.VMEM((TQ, Fp), jnp.float32),   # output accumulator
        ],
    )
    return pl.pallas_call(
        _flash_attn_kernel,
        out_shape=jax.ShapeDtypeStruct((B, N, D), x.dtype),
        grid_spec=grid_spec,
        compiler_params=pltpu.CompilerParams(
            dimension_semantics=("parallel", "parallel", "arbitrary"),
            vmem_limit_bytes=vmem_limit,
        ),
    )(qkv, qkv, qkv, params["wout"], params["bout"])


def attention_forward(x, params, *, tq=None, tk=None):
    """x: (B, N, D).  params: output of prepare_attention_params."""
    try:
        return _attention_impl(x, params, tq, tk, single_buffer_weights=True)
    except Exception:
        # pipeline_mode=pl.Buffered(1) unavailable on this jax build/backend:
        # fall back to default double-buffered resident weights (identical
        # semantics, slightly more VMEM).
        return _attention_impl(x, params, tq, tk, single_buffer_weights=False)


# --------------------------------------------------------------------------
# Pure-JAX reference (f32)
# --------------------------------------------------------------------------
def attention_reference(x, w_qkv, b_qkv, w_out, b_out):
    qkv = jnp.einsum('bnd,fd->bnf', x, w_qkv) + b_qkv
    q, k, v = jnp.split(qkv, 3, axis=-1)
    dots = jnp.einsum('biw,bjw->bij', q, k)          # no 1/sqrt(d), as torch
    attn = jax.nn.softmax(dots, axis=-1)
    out = jnp.einsum('bij,bjw->biw', attn, v)
    return jnp.einsum('bnw,dw->bnd', out, w_out) + b_out


# --------------------------------------------------------------------------
if __name__ == "__main__":
    # Small shapes consistent with the module (head = 1).
    B, N, DIM, OUT_DIM = 2, 8, 32, 16

    key = jax.random.PRNGKey(0)
    kx, k1, k2, k3, k4 = jax.random.split(key, 5)

    x = jax.random.normal(kx, (B, N, DIM), dtype=jnp.float32)
    lim_qkv = 1.0 / (DIM ** 0.5)
    w_qkv = jax.random.uniform(k1, (3 * OUT_DIM, DIM), jnp.float32,
                               -lim_qkv, lim_qkv)
    b_qkv = jax.random.uniform(k2, (3 * OUT_DIM,), jnp.float32,
                               -lim_qkv, lim_qkv)
    lim_out = 1.0 / (OUT_DIM ** 0.5)
    w_out = jax.random.uniform(k3, (DIM, OUT_DIM), jnp.float32,
                               -lim_out, lim_out)
    b_out = jax.random.uniform(k4, (DIM,), jnp.float32, -lim_out, lim_out)

    # Prepare (split / fuse / pad / transpose / cast) the weights once.
    params = prepare_attention_params(w_qkv, b_qkv, w_out, b_out,
                                      out_dim=OUT_DIM,
                                      compute_dtype=jnp.bfloat16)

    y = attention_forward(x, params)
    y = jax.block_until_ready(y)

    y_ref = attention_reference(x, w_qkv, b_qkv, w_out, b_out)
    assert y.shape == (B, N, DIM)
    # bf16 MXU operands + bf16 exp -> relaxed tolerance vs the f32 reference.
    assert jnp.allclose(y, y_ref, atol=5e-2, rtol=5e-2), "mismatch vs reference"

    print("KERNEL_OK")
</pallas_src>

<mosaic_0001>
module attributes {stable_mosaic.version = 11 : i64} {
  func.func @_qkv_proj_kernel(%arg0: i32, %arg1: i32, %arg2: memref<1x8x32xbf16, #tpu.memory_space<vmem>>, %arg3: memref<32x384xbf16, #tpu.memory_space<vmem>>, %arg4: memref<1x384xf32, #tpu.memory_space<vmem>>, %arg5: memref<1x8x384xbf16, #tpu.memory_space<vmem>>) attributes {dimension_semantics = [#tpu.dimension_semantics<parallel>, #tpu.dimension_semantics<parallel>], iteration_bounds = array<i64: 2, 1>, scalar_prefetch = 0 : i64, scratch_operands = 0 : i64, tpu.core_type = #tpu.core_type<tc>, window_params = [{transform_indices = @transform_0, window_bounds = array<i64: 1, 8, 32>}, {pipeline_mode = #tpu.pipeline_mode<synchronous>, transform_indices = @transform_1, window_bounds = array<i64: 32, 384>}, {pipeline_mode = #tpu.pipeline_mode<synchronous>, transform_indices = @transform_2, window_bounds = array<i64: 1, 384>}, {transform_indices = @transform_3, window_bounds = array<i64: 1, 8, 384>}]} {
    %c0 = arith.constant 0 : index
    %c0_0 = arith.constant 0 : index
    %c0_1 = arith.constant 0 : index
    %0 = vector.load %arg2[%c0, %c0_0, %c0_1] : memref<1x8x32xbf16, #tpu.memory_space<vmem>>, vector<1x8x32xbf16>
    %1 = vector.shape_cast %0 : vector<1x8x32xbf16> to vector<8x32xbf16>
    %c0_2 = arith.constant 0 : index
    %c0_3 = arith.constant 0 : index
    %2 = vector.load %arg3[%c0_2, %c0_3] : memref<32x384xbf16, #tpu.memory_space<vmem>>, vector<32x384xbf16>
    %cst = arith.constant dense<0.000000e+00> : vector<8x384xf32>
    %3 = tpu.matmul %1, %2, %cst {dimension_numbers = #tpu.dot_dimension_numbers<[1], [0], [0], [1], [0, 0, 1, 1], [], []>} : vector<8x32xbf16>, vector<32x384xbf16>, vector<8x384xf32> -> vector<8x384xf32>
    %c0_4 = arith.constant 0 : index
    %c0_5 = arith.constant 0 : index
    %4 = vector.load %arg4[%c0_4, %c0_5] : memref<1x384xf32, #tpu.memory_space<vmem>>, vector<1x384xf32>
    %5 = vector.broadcast %4 : vector<1x384xf32> to vector<8x384xf32>
    %6 = arith.addf %3, %5 : vector<8x384xf32>
    %7 = arith.truncf %6 : vector<8x384xf32> to vector<8x384xbf16>
    %c0_6 = arith.constant 0 : index
    %c0_7 = arith.constant 0 : index
    %c0_8 = arith.constant 0 : index
    %8 = vector.load %arg5[%c0_6, %c0_7, %c0_8] : memref<1x8x384xbf16, #tpu.memory_space<vmem>>, vector<1x8x384xbf16>
    %9 = vector.shape_cast %8 : vector<1x8x384xbf16> to vector<8x384xbf16>
    %10 = vector.shape_cast %7 : vector<8x384xbf16> to vector<1x8x384xbf16>
    tpu.vector_store %arg5[%c0_6, %c0_7, %c0_8], %10 {strides = array<i32>} : memref<1x8x384xbf16, #tpu.memory_space<vmem>>, vector<1x8x384xbf16>,
    return
  }
  func.func @transform_0(%arg0: i32, %arg1: i32) -> (i32, i32, i32) {
    %c0_i32 = arith.constant 0 : i32
    %c0_i32_0 = arith.constant 0 : i32
    return %arg0, %arg1, %c0_i32 : i32, i32, i32
  }
  func.func @transform_1(%arg0: i32, %arg1: i32) -> (i32, i32) {
    %c0_i32 = arith.constant 0 : i32
    %c0_i32_0 = arith.constant 0 : i32
    %c0_i32_1 = arith.constant 0 : i32
    return %c0_i32, %c0_i32_0 : i32, i32
  }
  func.func @transform_2(%arg0: i32, %arg1: i32) -> (i32, i32) {
    %c0_i32 = arith.constant 0 : i32
    %c0_i32_0 = arith.constant 0 : i32
    %c0_i32_1 = arith.constant 0 : i32
    return %c0_i32, %c0_i32_0 : i32, i32
  }
  func.func @transform_3(%arg0: i32, %arg1: i32) -> (i32, i32, i32) {
    %c0_i32 = arith.constant 0 : i32
    %c0_i32_0 = arith.constant 0 : i32
    return %arg0, %arg1, %c0_i32 : i32, i32, i32
  }
}

module attributes {stable_mosaic.version = 11 : i64} {
  func.func @_qkv_proj_kernel(%arg0: i32, %arg1: i32, %arg2: memref<1x8x32xbf16, #tpu.memory_space<vmem>>, %arg3: memref<32x384xbf16, #tpu.memory_space<vmem>>, %arg4: memref<1x384xf32, #tpu.memory_space<vmem>>, %arg5: memref<1x8x384xbf16, #tpu.memory_space<vmem>>) attributes {dimension_semantics = [#tpu.dimension_semantics<parallel>, #tpu.dimension_semantics<parallel>], iteration_bounds = array<i64: 2, 1>, scalar_prefetch = 0 : i64, scratch_operands = 0 : i64, tpu.core_type = #tpu.core_type<tc>, window_params = [{transform_indices = @transform_0, window_bounds = array<i64: 1, 8, 32>}, {pipeline_mode = #tpu.pipeline_mode<synchronous>, transform_indices = @transform_1, window_bounds = array<i64: 32, 384>}, {pipeline_mode = #tpu.pipeline_mode<synchronous>, transform_indices = @transform_2, window_bounds = array<i64: 1, 384>}, {transform_indices = @transform_3, window_bounds = array<i64: 1, 8, 384>}]} {
    %c0 = arith.constant 0 : index
    %c0_0 = arith.constant 0 : index
    %c0_1 = arith.constant 0 : index
    %0 = vector.load %arg2[%c0, %c0_0, %c0_1] : memref<1x8x32xbf16, #tpu.memory_space<vmem>>, vector<1x8x32xbf16>
    %1 = vector.shape_cast %0 : vector<1x8x32xbf16> to vector<8x32xbf16>
    %c0_2 = arith.constant 0 : index
    %c0_3 = arith.constant 0 : index
    %2 = vector.load %arg3[%c0_2, %c0_3] : memref<32x384xbf16, #tpu.memory_space<vmem>>, vector<32x384xbf16>
    %cst = arith.constant dense<0.000000e+00> : vector<8x384xf32>
    %3 = tpu.matmul %1, %2, %cst {dimension_numbers = #tpu.dot_dimension_numbers<[1], [0], [0], [1], [0, 0, 1, 1], [], []>} : vector<8x32xbf16>, vector<32x384xbf16>, vector<8x384xf32> -> vector<8x384xf32>
    %c0_4 = arith.constant 0 : index
    %c0_5 = arith.constant 0 : index
    %4 = vector.load %arg4[%c0_4, %c0_5] : memref<1x384xf32, #tpu.memory_space<vmem>>, vector<1x384xf32>
    %5 = vector.broadcast %4 : vector<1x384xf32> to vector<8x384xf32>
    %6 = arith.addf %3, %5 : vector<8x384xf32>
    %7 = arith.truncf %6 : vector<8x384xf32> to vector<8x384xbf16>
    %c0_6 = arith.constant 0 : index
    %c0_7 = arith.constant 0 : index
    %c0_8 = arith.constant 0 : index
    %8 = vector.load %arg5[%c0_6, %c0_7, %c0_8] : memref<1x8x384xbf16, #tpu.memory_space<vmem>>, vector<1x8x384xbf16>
    %9 = vector.shape_cast %8 : vector<1x8x384xbf16> to vector<8x384xbf16>
    %10 = vector.shape_cast %7 : vector<8x384xbf16> to vector<1x8x384xbf16>
    tpu.vector_store %arg5[%c0_6, %c0_7, %c0_8], %10 {strides = array<i32>} : memref<1x8x384xbf16, #tpu.memory_space<vmem>>, vector<1x8x384xbf16>,
    return
  }
  func.func @transform_0(%arg0: i32, %arg1: i32) -> (i32, i32, i32) {
    %c0_i32 = arith.constant 0 : i32
    %c0_i32_0 = arith.constant 0 : i32
    return %arg0, %arg1, %c0_i32 : i32, i32, i32
  }
  func.func @transform_1(%arg0: i32, %arg1: i32) -> (i32, i32) {
    %c0_i32 = arith.constant 0 : i32
    %c0_i32_0 = arith.constant 0 : i32
    %c0_i32_1 = arith.constant 0 : i32
    return %c0_i32, %c0_i32_0 : i32, i32
  }
  func.func @transform_2(%arg0: i32, %arg1: i32) -> (i32, i32) {
    %c0_i32 = arith.constant 0 : i32
    %c0_i32_0 = arith.constant 0 : i32
    %c0_i32_1 = arith.constant 0 : i32
    return %c0_i32, %c0_i32_0 : i32, i32
  }
  func.func @transform_3(%arg0: i32, %arg1: i32) -> (i32, i32, i32) {
    %c0_i32 = arith.constant 0 : i32
    %c0_i32_0 = arith.constant 0 : i32
    return %arg0, %arg1, %c0_i32 : i32, i32, i32
  }
}

</mosaic_0001>

<bundles_post_ra>
// kernel: tpu_custom_call.1
= control target key start
LH: loop header
LB: loop body
LE: loop exit
PB: predicated region body
PF: predicated region fallthrough
CT: control target
= control target key end

     0   :  { %8 = vsyncpa [#allocation3], 0  ;;  %s935_s0 = inlined_call_operand.hbm [shape: bf16[2,8,32], index: 0, kind: input, shape index: {}]   ;;  %s936_s1 = inlined_call_operand.hbm [shape: bf16[32,384], index: 1, kind: input, shape index: {}]   ;;  %s937_s2 = inlined_call_operand.hbm [shape: f32[1,384], index: 2, kind: input, shape index: {}]   ;;  %s938_s3 = inlined_call_operand.hbm [shape: bf16[2,8,384], index: 3, kind: output, shape index: {}]  }
   0x1   :  { %10 = vsyncpa [#allocation3 + $0x1], 0 }
   0x2   :  { %11 = vsyncpa [#allocation6], 0 }
   0x3   :  { %12 = vsyncpa [#allocation4], 0 }
   0x4   :  { %14 = vsyncpa [#allocation4 + $0x1], 0  ;;  %s790_s12 = smov 0   ;;  %s792_s13 = smov 0  }
   0x5   :  { %s794_s14 = smov 0   ;;  %s796_s15 = smov 0  }
   0x6   :  { %s798_s16 = smov 0   ;;  %s800_s17 = smov 0  }
   0x7 LB: > { %s453_s18 = sadd.s32 4294967295, %s764_s17   ;;  %p455_p0 = scmp.ge.s32.totalorder %s764_s17, 1  ;;  %s764_s17 = sphi %s800_s17, %s20_s17   ;;  %s760_s16 = sphi %s798_s16, %s948_s16   ;;  %s756_s15 = sphi %s796_s15, %s947_s15   ;;  %s752_s14 = sphi %s794_s14, %s946_s14   ;;  %s748_s13 = sphi %s792_s13, %s945_s13   ;;  %s744_s12 = sphi %s790_s12, %s944_s12  }
   0x8   : > { %p824_p1 = scmp.eq.s32.totalorder %s453_s18, 0  ;;  %p135_p2 = scmp.lt.s32.totalorder %s764_s17, 3 }
   0x9   : > { %s146_s22 = sshll.u32 %s936_s1, 4  ;;  %s766_s24 = smov [#allocation5]   ;;  %s147_s22 = int_to_ptr.hbm [resolvable:$true] %s146_s22 }
   0xa   : > { %p832_p3 = pnand %p455_p0, %p135_p2  ;;  %s148_s25 = sshll.u32 %s766_s24, 4  ;;  %s149_s25 = int_to_ptr.vmem [resolvable:$true] %s148_s25 }
   0xb   : > { %p458_p6 = scmp.ge.s32.totalorder %s764_s17, 2  ;;  %s161_s28 = sshll.u32 %s937_s2, 4  ;;  %s162_s28 = int_to_ptr.hbm [resolvable:$true] %s161_s28 }
   0xc   : > { %p515_p4 = pneg %p832_p3  ;;  %s767_s29 = smov 192  }
   0xd   : > { %s768_s30 = smov 12   ;;  %s769_s4 = smov [#allocation7]  }
   0xe   : > { %p516_p5 = pnand %p515_p4, %p824_p1  ;;  %s163_s5 = sshll.u32 %s769_s4, 4  ;;  %s164_s5 = int_to_ptr.vmem [resolvable:$true] %s163_s5 }
   0xf   : > { %s32_s6 = sadd.s32 1, %s760_s16  ;;  %s454_s7 = sadd.s32 4294967294, %s764_s17  }
  0x10   : > { %518 = dma.hbm_to_vmem [thread:$0]  (!%p516_p5), %s147_s22, 768, %s149_s25, [#allocation6], %s767_s29, %s767_s29, %s768_s30  }
  0x11   : > { %521 = dma.hbm_to_vmem [thread:$0]  (!%p516_p5), %s162_s28, 48, %s164_s5, [#allocation6]  }
  0x12   : > { %p34_p7 = scmp.ge.s32.totalorder %s32_s6, 2  ;;  %s41_s8 = sadd.s32 1, %s752_s14 }
  0x13   : > { %p48_p8 = scmp.ne.s32.totalorder %s752_s14, %s748_s13  ;;  %p49_p9 = scmp.eq.s32.totalorder %s764_s17, 0 }
  0x14   : > { %s950_s6 = smov (%p34_p7, %s32_s6), 0  ;;  %p54_p10 = scmp.ne.s32.totalorder %s748_s13, %s744_s12 }
  0x15   : > { %s36_s9 = ssub.s32 %s760_s16, %s950_s6  ;;  %p122_p11 = scmp.eq.s32.totalorder %s453_s18, 1 }
  0x16   : > { %p39_p12 = scmp.eq.s32.totalorder %s36_s9, 0  ;;  %p860_p13 = por %p824_p1, %p54_p10 }
  0x17   : > { %p864_p0 = por %p122_p11, %p48_p8  ;;  %p128_p2 = scmp.eq.s32.totalorder %s454_s7, 1 }
  0x18   : > { %s869_s20 = scalar_select %p39_p12, %s752_s14, %s41_s8  }
  0x19   : > { %p50_p4 = por %p49_p9, %p48_p8  ;;  %p871_p5 = por %p128_p2, %p54_p10 }
  0x1a   : > { %s174_s22 = sand.u32 1, %s752_s14   ;;  %s460_s18 = sshll.u32 %s760_s16, 2 }
  0x1b   : > { %p532_p7 = scmp.lt.s32.totalorder %s764_s17, 2  ;;  %s459_s24 = sshll.u32 %s174_s22, 2 }
  0x1c   : > { %s183_s27 = scalar_lea.hbm %s935_s0, %s460_s18  ;;  %s178_s29 = scalar_lea.vmem [#allocation2], %s459_s24 }
  0x1d   : > { %s185_s28 = sshll.u32 %s183_s27, 4  ;;  %s187_s30 = sshll.u32 %s178_s29, 4  ;;  %s186_s28 = int_to_ptr.hbm [resolvable:$true] %s185_s28  ;;  %s188_s30 = int_to_ptr.vmem [resolvable:$true] %s187_s30 }
  0x1e   : > { %p523_p11 = pnand %p532_p7, %p50_p4  ;;  %s175_s4 = scalar_lea.sflag [#allocation3], %s174_s22 }
  0x1f   : > { %196 = sbr.rel (%p832_p3) target bundleno = 191 (0xbf), region = 32  ;;  %s884_s5 = sand.u32 (!%p832_p3), 1, %s748_s13  }
  0x20   : > { %525 = dma.hbm_to_vmem [thread:$0]  (!%p523_p11), %s186_s28, 64, %s188_s30, %s175_s4  }
  0x21   : > { %s462_s7 = sshll.u32 (!%p832_p3), %s884_s5, 2  ;;  %s199_s8 = scalar_lea.sflag (!%p832_p3), [#allocation3], %s884_s5 }
  0x22   : > { %s202_s9 = scalar_lea.vmem (!%p832_p3), [#allocation2], %s462_s7 }
  0x24   : > { %731 = dma.done.wait (%p860_p13), %s199_s8, 64  }
  0x25   : > { %733 = vsyncadd (%p860_p13), %s199_s8, 4294967232 }
  0x26   : > { %735 = dma.done.wait (%p824_p1), [#allocation6], 816  }
  0x27   : > { %737 = vsyncadd (%p824_p1), [#allocation6], 4294966480  ;;  %v479_v0 = vld [vmem:[#allocation5 + $0x18] sm:$0xf]  ;;  %v499_v1 = vld [vmem:[#allocation5 + $0x20] sm:$0xf0] }
  0x28   : > { %v498_v2 = vld [vmem:[#allocation5 + $0x1c] sm:$0xf]  ;;  %v480_v3 = vor.u32 %v499_v1, %v479_v0  ;;  %v481_v4 = vld [vmem:[#allocation5 + $0x24] sm:$0xf0]  ;;  %v487_v5 = vld [vmem:[#allocation5 + $0x20] sm:$0xf] }
  0x29   : > { %v500_v6 = vld [vmem:[#allocation5 + $0x28] sm:$0xf0]  ;;  %v484_v7 = vor.u32 %v498_v2, %v481_v4  ;;  %v467_v9 = vld [vmem:[#allocation5] sm:$0xf]  ;;  %v495_v11 = vld [vmem:[#allocation5 + $0x4] sm:$0xf] }
  0x2a   : > { %v488_v8 = vor.u32 %v500_v6, %v487_v5  ;;  %v496_v10 = vld [vmem:[#allocation5 + $0x8] sm:$0xf0]  ;;  %296 = vmatpush.bf16.msra.mxu0 %v480_v3  ;;  %v469_v13 = vld [vmem:[#allocation5 + $0xc] sm:$0xf0]  ;;  %v475_v14 = vld [vmem:[#allocation5 + $0x8] sm:$0xf] }
  0x2b   : > { %v468_v12 = vor.u32 %v496_v10, %v467_v9  ;;  %v497_v15 = vld [vmem:[#allocation5 + $0x10] sm:$0xf0]  ;;  %309 = vmatpush.bf16.msra.mxu1 %v484_v7  ;;  %v472_v16 = vor.u32 %v495_v11, %v469_v13  ;;  %v237_v18 = vld [vmem:[%s202_s9] sm:$0xf]  ;;  %vm286_vm0 = vcmask 261120   ;;  %s501_s19 = smul.u32 12, %s884_s5 }
  0x2c   : > { %322 = vmatpush.bf16.msra.mxu2 %v488_v8  ;;  %v476_v17 = vor.u32 %v497_v15, %v475_v14  ;;  %v246_v19 = vld [vmem:[#allocation7] sm:$0x7]  ;;  %s502_s23 = smul.u32 12, %s756_s15  ;;  %s334_s15 = scalar_lea.sflag [#allocation4], %s884_s5 }
  0x2d   : > { %v248_v20 = vperm.slane %v246_v19, 0  ;;  %v249_v21 = vperm.slane %v246_v19, 1  ;;  %v250_v27 = vperm.slane %v246_v19, 2  ;;  %s235_s24 = scalar_lea.vmem [#allocation8], %s501_s19  ;;  %s698_s4 = scalar_lea.hbm %s938_s3, 24 }
  0x2e   : > { %297 = vmatpush.bf16.msra.mxu0 %v468_v12  ;;  %s347_s18 = scalar_lea.hbm %s938_s3, %s502_s23  ;;  %s349_s25 = sshll.u32 %s235_s24, 4  ;;  %s350_s25 = int_to_ptr.vmem [resolvable:$true] %s349_s25 }
  0x2f   : > { %310 = vmatpush.bf16.msra.mxu1 %v472_v16  ;;  %s351_s26 = sshll.u32 %s347_s18, 4  ;;  %s352_s26 = int_to_ptr.hbm [resolvable:$true] %s351_s26 }
  0x30   : > { %323 = vmatpush.bf16.msra.mxu2 %v476_v17  ;;  %s692_s27 = sshra.s32 %s352_s26, 4  ;;  %s693_s27 = int_to_ptr.hbm [resolvable:$true] %s692_s27 }
  0x31   : > { %489 = vmatmul.msk.bf16.vlgmr.msra.gmra.mxu0 %vm286_vm0, %v237_v18  ;;  %s694_s28 = scalar_lea.hbm %s693_s27, 12  ;;  %p699_p9 = scmp.lt.s32.totalorder %s693_s27, %s938_s3 }
  0x32   : > { %490 = vmatmul.msk.bf16.vlgmr.msra.gmra.mxu1 %vm286_vm0, %v237_v18  ;;  %p695_p1 = scmp.ne.s32.totalorder %s693_s27, %s694_s28  ;;  %p700_p10 = scmp.lt.s32.totalorder %s698_s4, %s694_s28 }
  0x33   : > { %491 = vmatmul.msk.bf16.vlgmr.msra.gmra.mxu2 %vm286_vm0, %v237_v18 }
  0x34   : > { %p696_p3 = pnand %p695_p1, %p864_p0  ;;  %p701_p12 = por %p700_p10, %p699_p9 }
  0x36   : > { %p697_p8 = pneg %p696_p3 }
  0x38   : > { %p702_p13 = pnand %p701_p12, %p697_p8 }
  0xae   : > { %v299_v22 = vpop.f32.mrf.mxu0 }
  0xaf   : > { %v300_v23 = vadd.f32 %v299_v22, %v248_v20  ;;  %v312_v24 = vpop.f32.mrf.mxu1 }
  0xb0   : > { %v313_v25 = vadd.f32 %v312_v24, %v249_v21 }
  0xb2   : > { %v329_v26 = vpack.c.bf16 %v313_v25, %v300_v23 }
  0xb4   : > { %331 = vst [vmem:[%s235_s24] sm:$0xff] %v329_v26 }
  0xb6   : > { %v325_v28 = vpop.f32.mrf.mxu2  ;;  %v301_v30 = vpop.f32.mrf.mxu0 }
  0xb7   : > { %v326_v29 = vadd.f32 %v325_v28, %v250_v27  ;;  %v314_v31 = vpop.f32.mrf.mxu1 }
  0xb9   : > { %v330_v32 = vpack.c.bf16 %v326_v29, %v326_v29 }
  0xbb   : > { %332 = vst [vmem:[%s235_s24 + $0x8] sm:$0xf] %v330_v32 }
  0xbc   : > { %705 = shalt.err (!%p702_p13)
}
  0xbd   : > { %513 = dma.vmem_to_hbm [thread:$0]  (%p864_p0), %s350_s25, 192, %s352_s26, %s334_s15  }
  0xbe   : > { %v327_v33 = vpop.f32.mrf.mxu2 }
  0xbf PF: > { %s363_s5 = sand.u32 1, %s744_s12   ;;  %p527_p2 = pnand %p458_p6, %p871_p5 }
  0xc0   : > { %s364_s9 = scalar_lea.sflag [#allocation4], %s363_s5 }
  0xc1   : > { %p528_p4 = pneg %p527_p2 }
  0xc3   : > { %739 = dma.done.wait (%p528_p4), %s364_s9, 192  }
  0xc4   : > { %741 = vsyncadd (%p528_p4), %s364_s9, 4294967104  ;;  %s20_s17 = sadd.s32 1, %s764_s17   ;;  %s944_s12 = smov %s748_s13 }
  0xc5   : > { %p17_p7 = scmp.ge.s32.totalorder %s20_s17, 4   ;;  %s945_s13 = smov %s752_s14 }
  0xc6   : > { %s946_s14 = smov %s869_s20  ;;  %s947_s15 = smov %s760_s16 }
  0xc7   : > { %s948_s16 = smov %s950_s6  ;;  %19 = sbr.rel (!%p17_p7) target bundleno = 7 (0x7), region = 85 }
  0xcc   :  { %370 = vsyncpa [#allocation3], 1 }
  0xcd   :  { %372 = vsyncpa [#allocation3 + $0x1], 1 }
  0xce   :  { %373 = vsyncpa [#allocation6], 1 }
  0xcf   :  { %374 = vsyncpa [#allocation4], 1 }
  0xd0   :  { %376 = vsyncpa [#allocation4 + $0x1], 1 }

// kernel: tpu_custom_call.1
= control target key start
LH: loop header
LB: loop body
LE: loop exit
PB: predicated region body
PF: predicated region fallthrough
CT: control target
= control target key end

     0   :  { %8 = vsyncpa [#allocation3], 0  ;;  %s935_s0 = inlined_call_operand.hbm [shape: bf16[2,8,32], index: 0, kind: input, shape index: {}]   ;;  %s936_s1 = inlined_call_operand.hbm [shape: bf16[32,384], index: 1, kind: input, shape index: {}]   ;;  %s937_s2 = inlined_call_operand.hbm [shape: f32[1,384], index: 2, kind: input, shape index: {}]   ;;  %s938_s3 = inlined_call_operand.hbm [shape: bf16[2,8,384], index: 3, kind: output, shape index: {}]  }
   0x1   :  { %10 = vsyncpa [#allocation3 + $0x1], 0 }
   0x2   :  { %11 = vsyncpa [#allocation6], 0 }
   0x3   :  { %12 = vsyncpa [#allocation4], 0 }
   0x4   :  { %14 = vsyncpa [#allocation4 + $0x1], 0  ;;  %s790_s12 = smov 0   ;;  %s792_s13 = smov 0  }
   0x5   :  { %s794_s14 = smov 0   ;;  %s796_s15 = smov 0  }
   0x6   :  { %s798_s16 = smov 0   ;;  %s800_s17 = smov 0  }
   0x7 LB: > { %s453_s18 = sadd.s32 4294967295, %s764_s17   ;;  %p455_p0 = scmp.ge.s32.totalorder %s764_s17, 1  ;;  %s764_s17 = sphi %s800_s17, %s20_s17   ;;  %s760_s16 = sphi %s798_s16, %s948_s16   ;;  %s756_s15 = sphi %s796_s15, %s947_s15   ;;  %s752_s14 = sphi %s794_s14, %s946_s14   ;;  %s748_s13 = sphi %s792_s13, %s945_s13   ;;  %s744_s12 = sphi %s790_s12, %s944_s12  }
   0x8   : > { %p824_p1 = scmp.eq.s32.totalorder %s453_s18, 0  ;;  %p135_p2 = scmp.lt.s32.totalorder %s764_s17, 3 }
   0x9   : > { %s146_s22 = sshll.u32 %s936_s1, 4  ;;  %s766_s24 = smov [#allocation5]   ;;  %s147_s22 = int_to_ptr.hbm [resolvable:$true] %s146_s22 }
   0xa   : > { %p832_p3 = pnand %p455_p0, %p135_p2  ;;  %s148_s25 = sshll.u32 %s766_s24, 4  ;;  %s149_s25 = int_to_ptr.vmem [resolvable:$true] %s148_s25 }
   0xb   : > { %p458_p6 = scmp.ge.s32.totalorder %s764_s17, 2  ;;  %s161_s28 = sshll.u32 %s937_s2, 4  ;;  %s162_s28 = int_to_ptr.hbm [resolvable:$true] %s161_s28 }
   0xc   : > { %p515_p4 = pneg %p832_p3  ;;  %s767_s29 = smov 192  }
   0xd   : > { %s768_s30 = smov 12   ;;  %s769_s4 = smov [#allocation7]  }
   0xe   : > { %p516_p5 = pnand %p515_p4, %p824_p1  ;;  %s163_s5 = sshll.u32 %s769_s4, 4  ;;  %s164_s5 = int_to_ptr.vmem [resolvable:$true] %s163_s5 }
   0xf   : > { %s32_s6 = sadd.s32 1, %s760_s16  ;;  %s454_s7 = sadd.s32 4294967294, %s764_s17  }
  0x10   : > { %518 = dma.hbm_to_vmem [thread:$0]  (!%p516_p5), %s147_s22, 768, %s149_s25, [#allocation6], %s767_s29, %s767_s29, %s768_s30  }
  0x11   : > { %521 = dma.hbm_to_vmem [thread:$0]  (!%p516_p5), %s162_s28, 48, %s164_s5, [#allocation6]  }
  0x12   : > { %p34_p7 = scmp.ge.s32.totalorder %s32_s6, 2  ;;  %s41_s8 = sadd.s32 1, %s752_s14 }
  0x13   : > { %p48_p8 = scmp.ne.s32.totalorder %s752_s14, %s748_s13  ;;  %p49_p9 = scmp.eq.s32.totalorder %s764_s17, 0 }
  0x14   : > { %s950_s6 = smov (%p34_p7, %s32_s6), 0  ;;  %p54_p10 = scmp.ne.s32.totalorder %s748_s13, %s744_s12 }
  0x15   : > { %s36_s9 = ssub.s32 %s760_s16, %s950_s6  ;;  %p122_p11 = scmp.eq.s32.totalorder %s453_s18, 1 }
  0x16   : > { %p39_p12 = scmp.eq.s32.totalorder %s36_s9, 0  ;;  %p860_p13 = por %p824_p1, %p54_p10 }
  0x17   : > { %p864_p0 = por %p122_p11, %p48_p8  ;;  %p128_p2 = scmp.eq.s32.totalorder %s454_s7, 1 }
  0x18   : > { %s869_s20 = scalar_select %p39_p12, %s752_s14, %s41_s8  }
  0x19   : > { %p50_p4 = por %p49_p9, %p48_p8  ;;  %p871_p5 = por %p128_p2, %p54_p10 }
  0x1a   : > { %s174_s22 = sand.u32 1, %s752_s14   ;;  %s460_s18 = sshll.u32 %s760_s16, 2 }
  0x1b   : > { %p532_p7 = scmp.lt.s32.totalorder %s764_s17, 2  ;;  %s459_s24 = sshll.u32 %s174_s22, 2 }
  0x1c   : > { %s183_s27 = scalar_lea.hbm %s935_s0, %s460_s18  ;;  %s178_s29 = scalar_lea.vmem [#allocation2], %s459_s24 }
  0x1d   : > { %s185_s28 = sshll.u32 %s183_s27, 4  ;;  %s187_s30 = sshll.u32 %s178_s29, 4  ;;  %s186_s28 = int_to_ptr.hbm [resolvable:$true] %s185_s28  ;;  %s188_s30 = int_to_ptr.vmem [resolvable:$true] %s187_s30 }
  0x1e   : > { %p523_p11 = pnand %p532_p7, %p50_p4  ;;  %s175_s4 = scalar_lea.sflag [#allocation3], %s174_s22 }
  0x1f   : > { %196 = sbr.rel (%p832_p3) target bundleno = 191 (0xbf), region = 32  ;;  %s884_s5 = sand.u32 (!%p832_p3), 1, %s748_s13  }
  0x20   : > { %525 = dma.hbm_to_vmem [thread:$0]  (!%p523_p11), %s186_s28, 64, %s188_s30, %s175_s4  }
  0x21   : > { %s462_s7 = sshll.u32 (!%p832_p3), %s884_s5, 2  ;;  %s199_s8 = scalar_lea.sflag (!%p832_p3), [#allocation3], %s884_s5 }
  0x22   : > { %s202_s9 = scalar_lea.vmem (!%p832_p3), [#allocation2], %s462_s7 }
  0x24   : > { %731 = dma.done.wait (%p860_p13), %s199_s8, 64  }
  0x25   : > { %733 = vsyncadd (%p860_p13), %s199_s8, 4294967232 }
  0x26   : > { %735 = dma.done.wait (%p824_p1), [#allocation6], 816  }
  0x27   : > { %737 = vsyncadd (%p824_p1), [#allocation6], 4294966480  ;;  %v479_v0 = vld [vmem:[#allocation5 + $0x18] sm:$0xf]  ;;  %v499_v1 = vld [vmem:[#allocation5 + $0x20] sm:$0xf0] }
  0x28   : > { %v498_v2 = vld [vmem:[#allocation5 + $0x1c] sm:$0xf]  ;;  %v480_v3 = vor.u32 %v499_v1, %v479_v0  ;;  %v481_v4 = vld [vmem:[#allocation5 + $0x24] sm:$0xf0]  ;;  %v487_v5 = vld [vmem:[#allocation5 + $0x20] sm:$0xf] }
  0x29   : > { %v500_v6 = vld [vmem:[#allocation5 + $0x28] sm:$0xf0]  ;;  %v484_v7 = vor.u32 %v498_v2, %v481_v4  ;;  %v467_v9 = vld [vmem:[#allocation5] sm:$0xf]  ;;  %v495_v11 = vld [vmem:[#allocation5 + $0x4] sm:$0xf] }
  0x2a   : > { %v488_v8 = vor.u32 %v500_v6, %v487_v5  ;;  %v496_v10 = vld [vmem:[#allocation5 + $0x8] sm:$0xf0]  ;;  %296 = vmatpush.bf16.msra.mxu0 %v480_v3  ;;  %v469_v13 = vld [vmem:[#allocation5 + $0xc] sm:$0xf0]  ;;  %v475_v14 = vld [vmem:[#allocation5 + $0x8] sm:$0xf] }
  0x2b   : > { %v468_v12 = vor.u32 %v496_v10, %v467_v9  ;;  %v497_v15 = vld [vmem:[#allocation5 + $0x10] sm:$0xf0]  ;;  %309 = vmatpush.bf16.msra.mxu1 %v484_v7  ;;  %v472_v16 = vor.u32 %v495_v11, %v469_v13  ;;  %v237_v18 = vld [vmem:[%s202_s9] sm:$0xf]  ;;  %vm286_vm0 = vcmask 261120   ;;  %s501_s19 = smul.u32 12, %s884_s5 }
  0x2c   : > { %322 = vmatpush.bf16.msra.mxu2 %v488_v8  ;;  %v476_v17 = vor.u32 %v497_v15, %v475_v14  ;;  %v246_v19 = vld [vmem:[#allocation7] sm:$0x7]  ;;  %s502_s23 = smul.u32 12, %s756_s15  ;;  %s334_s15 = scalar_lea.sflag [#allocation4], %s884_s5 }
  0x2d   : > { %v248_v20 = vperm.slane %v246_v19, 0  ;;  %v249_v21 = vperm.slane %v246_v19, 1  ;;  %v250_v27 = vperm.slane %v246_v19, 2  ;;  %s235_s24 = scalar_lea.vmem [#allocation8], %s501_s19  ;;  %s698_s4 = scalar_lea.hbm %s938_s3, 24 }
  0x2e   : > { %297 = vmatpush.bf16.msra.mxu0 %v468_v12  ;;  %s347_s18 = scalar_lea.hbm %s938_s3, %s502_s23  ;;  %s349_s25 = sshll.u32 %s235_s24, 4  ;;  %s350_s25 = int_to_ptr.vmem [resolvable:$true] %s349_s25 }
  0x2f   : > { %310 = vmatpush.bf16.msra.mxu1 %v472_v16  ;;  %s351_s26 = sshll.u32 %s347_s18, 4  ;;  %s352_s26 = int_to_ptr.hbm [resolvable:$true] %s351_s26 }
  0x30   : > { %323 = vmatpush.bf16.msra.mxu2 %v476_v17  ;;  %s692_s27 = sshra.s32 %s352_s26, 4  ;;  %s693_s27 = int_to_ptr.hbm [resolvable:$true] %s692_s27 }
  0x31   : > { %489 = vmatmul.msk.bf16.vlgmr.msra.gmra.mxu0 %vm286_vm0, %v237_v18  ;;  %s694_s28 = scalar_lea.hbm %s693_s27, 12  ;;  %p699_p9 = scmp.lt.s32.totalorder %s693_s27, %s938_s3 }
  0x32   : > { %490 = vmatmul.msk.bf16.vlgmr.msra.gmra.mxu1 %vm286_vm0, %v237_v18  ;;  %p695_p1 = scmp.ne.s32.totalorder %s693_s27, %s694_s28  ;;  %p700_p10 = scmp.lt.s32.totalorder %s698_s4, %s694_s28 }
  0x33   : > { %491 = vmatmul.msk.bf16.vlgmr.msra.gmra.mxu2 %vm286_vm0, %v237_v18 }
  0x34   : > { %p696_p3 = pnand %p695_p1, %p864_p0  ;;  %p701_p12 = por %p700_p10, %p699_p9 }
  0x36   : > { %p697_p8 = pneg %p696_p3 }
  0x38   : > { %p702_p13 = pnand %p701_p12, %p697_p8 }
  0xae   : > { %v299_v22 = vpop.f32.mrf.mxu0 }
  0xaf   : > { %v300_v23 = vadd.f32 %v299_v22, %v248_v20  ;;  %v312_v24 = vpop.f32.mrf.mxu1 }
  0xb0   : > { %v313_v25 = vadd.f32 %v312_v24, %v249_v21 }
  0xb2   : > { %v329_v26 = vpack.c.bf16 %v313_v25, %v300_v23 }
  0xb4   : > { %331 = vst [vmem:[%s235_s24] sm:$0xff] %v329_v26 }
  0xb6   : > { %v325_v28 = vpop.f32.mrf.mxu2  ;;  %v301_v30 = vpop.f32.mrf.mxu0 }
  0xb7   : > { %v326_v29 = vadd.f32 %v325_v28, %v250_v27  ;;  %v314_v31 = vpop.f32.mrf.mxu1 }
  0xb9   : > { %v330_v32 = vpack.c.bf16 %v326_v29, %v326_v29 }
  0xbb   : > { %332 = vst [vmem:[%s235_s24 + $0x8] sm:$0xf] %v330_v32 }
  0xbc   : > { %705 = shalt.err (!%p702_p13)
}
  0xbd   : > { %513 = dma.vmem_to_hbm [thread:$0]  (%p864_p0), %s350_s25, 192, %s352_s26, %s334_s15  }
  0xbe   : > { %v327_v33 = vpop.f32.mrf.mxu2 }
  0xbf PF: > { %s363_s5 = sand.u32 1, %s744_s12   ;;  %p527_p2 = pnand %p458_p6, %p871_p5 }
  0xc0   : > { %s364_s9 = scalar_lea.sflag [#allocation4], %s363_s5 }
  0xc1   : > { %p528_p4 = pneg %p527_p2 }
  0xc3   : > { %739 = dma.done.wait (%p528_p4), %s364_s9, 192  }
  0xc4   : > { %741 = vsyncadd (%p528_p4), %s364_s9, 4294967104  ;;  %s20_s17 = sadd.s32 1, %s764_s17   ;;  %s944_s12 = smov %s748_s13 }
  0xc5   : > { %p17_p7 = scmp.ge.s32.totalorder %s20_s17, 4   ;;  %s945_s13 = smov %s752_s14 }
  0xc6   : > { %s946_s14 = smov %s869_s20  ;;  %s947_s15 = smov %s760_s16 }
  0xc7   : > { %s948_s16 = smov %s950_s6  ;;  %19 = sbr.rel (!%p17_p7) target bundleno = 7 (0x7), region = 85 }
  0xcc   :  { %370 = vsyncpa [#allocation3], 1 }
  0xcd   :  { %372 = vsyncpa [#allocation3 + $0x1], 1 }
  0xce   :  { %373 = vsyncpa [#allocation6], 1 }
  0xcf   :  { %374 = vsyncpa [#allocation4], 1 }
  0xd0   :  { %376 = vsyncpa [#allocation4 + $0x1], 1 }

</bundles_post_ra>
